<compile_context>
chip_gen: v7x
topology: tpu7x:2x2x1
jax: 0.10.0
libtpu: 0.0.40
codegen_flags: <defaults>
</compile_context>

<pallas_src>
import math
import jax
import jax.numpy as jnp
from jax.experimental import pallas as pl
from jax.experimental.pallas import tpu as pltpu

# ----- model hyper-parameters (small, consistent with the module) -----
VOCAB = 50
VOCAB_PAD = 64        # vocab table padded to a nice contraction size
SEQ_LEN = 8           # S
HID = 32              # seq_mid_hid (H)
NUM_HEADS = 4
HEAD_DIM = HID // NUM_HEADS
LN_EPS = 1e-5         # PyTorch nn.LayerNorm default

MAX_TB = 512          # batch-tile cap: ~7 MiB of blocks+temps per step, safe on v7x


def seq_encoder_kernel(ids_ref, mask_ref, pos_ref, wtab_ref, wqkv_ref, vecs_ref,
                       ctx_ref, probs_ref):
    # ids_ref : (TB*S, 1) int32       mask_ref: (TB, 1, S) f32
    # pos_ref : (S, H)                wtab_ref: (VOCAB_PAD, H)
    # wqkv_ref: (H, 3H)  (x @ W + b layout, [Wq|Wk|Wv] along columns)
    # vecs_ref: (8, 3H)  row0=[bq|bk|bv], row1[:H]=gamma, row2[:H]=beta
    # ctx_ref : (TB, S, H)            probs_ref: (TB, S, NUM_HEADS*S)
    TBS = ids_ref.shape[0]
    TB = TBS // SEQ_LEN

    # --- embedding gather as a one-hot MXU matmul (vocab is tiny) ---
    ids = ids_ref[...]                                                 # (TBS, 1)
    vocab_iota = jax.lax.broadcasted_iota(jnp.int32, (TBS, VOCAB_PAD), 1)
    onehot = (ids == vocab_iota).astype(jnp.float32)                   # (TBS, VPAD)
    words = jnp.dot(onehot, wtab_ref[...],
                    preferred_element_type=jnp.float32)                # (TBS, H)

    # add position embeddings (broadcast over the batch tile)
    emb = words.reshape(TB, SEQ_LEN, HID) + pos_ref[...][None, :, :]   # (TB, S, H)

    # --- LayerNorm over hidden axis (biased variance, eps=1e-5) ---
    mu = jnp.mean(emb, axis=-1, keepdims=True)
    xc = emb - mu
    var = jnp.mean(xc * xc, axis=-1, keepdims=True)
    xn = xc * jax.lax.rsqrt(var + LN_EPS)                              # (TB, S, H)

    gamma = vecs_ref[1:2, 0:HID]                                       # (1, H)
    beta = vecs_ref[2:3, 0:HID]                                        # (1, H)
    h2 = xn.reshape(TBS, HID) * gamma + beta                           # (TBS, H)

    # --- fused Q/K/V projection: one (TBS, H) x (H, 3H) MXU matmul ---
    qkv = jnp.dot(h2, wqkv_ref[...],
                  preferred_element_type=jnp.float32) + vecs_ref[0:1, :]  # (TBS, 3H)
    q = qkv[:, 0:HID].reshape(TB, SEQ_LEN, HID)
    k = qkv[:, HID:2 * HID].reshape(TB, SEQ_LEN, HID)
    v = qkv[:, 2 * HID:3 * HID].reshape(TB, SEQ_LEN, HID)

    # PyTorch semantics: extended = (1 - mask) * -10000 ; scores = scores * extended
    ext = (1.0 - mask_ref[...]) * (-10000.0)                           # (TB, 1, S)

    inv_sqrt_d = 1.0 / math.sqrt(HEAD_DIM)
    p_heads = []
    c_heads = []
    for hd in range(NUM_HEADS):                                        # tiny static loop
        lo = hd * HEAD_DIM
        hi = lo + HEAD_DIM
        qh = q[:, :, lo:hi]                                            # (TB, S, d)
        kh = k[:, :, lo:hi]
        vh = v[:, :, lo:hi]

        scores = jnp.einsum('bqd,bkd->bqk', qh, kh,
                            preferred_element_type=jnp.float32)        # (TB, S, S)
        scores = scores * inv_sqrt_d
        scores = scores * ext                                          # multiplicative mask

        m = jnp.max(scores, axis=-1, keepdims=True)
        e = jnp.exp(scores - m)
        p = e / jnp.sum(e, axis=-1, keepdims=True)                     # softmax(dim=-1)

        p_heads.append(p)
        c_heads.append(jnp.einsum('bqk,bkd->bqd', p, vh,
                                  preferred_element_type=jnp.float32))  # (TB, S, d)

    # single lane-wider stores (no per-head narrow stores)
    ctx_ref[...] = jnp.concatenate(c_heads, axis=-1)                   # (TB, S, H)
    probs_ref[...] = jnp.concatenate(p_heads, axis=-1)                 # (TB, S, NH*S)


def _batch_tiling(B):
    """Pick a batch-tile size TB and number of grid steps."""
    num_tiles = max(1, -(-B // MAX_TB))
    if B >= 16:
        num_tiles = max(num_tiles, 2)        # v7x: give each TensorCore a tile
    tb = -(-B // num_tiles)
    if tb >= 8:
        tb = -(-tb // 8) * 8                 # sublane-aligned batch tiles
    return tb, num_tiles


def seq_encoder_forward(x_seq, mask, params):
    """x_seq: (B, S) int32 token ids, mask: (B, S) float (1=keep, 0=pad)."""
    B, S = x_seq.shape
    H = HID

    TB, num_tiles = _batch_tiling(B)
    B_pad = TB * num_tiles
    if B_pad != B:
        x_seq = jnp.pad(x_seq, ((0, B_pad - B), (0, 0)))                        # pad token 0
        mask = jnp.pad(mask, ((0, B_pad - B), (0, 0)), constant_values=1.0)

    # --- packed invariant operands (one DMA each instead of many) ---
    pos = params["pos_emb"][:S]                                                 # (S, H)
    wtab = jnp.zeros((VOCAB_PAD, H), jnp.float32).at[:VOCAB].set(params["word_emb"])
    w_qkv = jnp.concatenate([params["wq"], params["wk"], params["wv"]], axis=1)  # (H, 3H)
    vecs = jnp.zeros((8, 3 * H), jnp.float32)
    vecs = vecs.at[0, :].set(
        jnp.concatenate([params["bq"], params["bk"], params["bv"]]))
    vecs = vecs.at[1, :H].set(params["ln_gamma"])
    vecs = vecs.at[2, :H].set(params["ln_beta"])

    ids2 = x_seq.reshape(B_pad * S, 1).astype(jnp.int32)                        # (B_pad*S, 1)
    mask3 = mask.reshape(B_pad, 1, S).astype(jnp.float32)                       # (B_pad, 1, S)

    out_shapes = (
        jax.ShapeDtypeStruct((B_pad, S, H), jnp.float32),               # context_layer
        jax.ShapeDtypeStruct((B_pad, S, NUM_HEADS * S), jnp.float32),   # probs (packed)
    )

    full2d = lambda b: (0, 0)
    ctx, probs_cat = pl.pallas_call(
        seq_encoder_kernel,
        out_shape=out_shapes,
        grid=(num_tiles,),
        in_specs=[
            pl.BlockSpec((TB * S, 1), lambda b: (b, 0)),        # token ids
            pl.BlockSpec((TB, 1, S), lambda b: (b, 0, 0)),      # mask
            pl.BlockSpec((S, H), full2d),                       # pos emb
            pl.BlockSpec((VOCAB_PAD, H), full2d),               # word emb table
            pl.BlockSpec((H, 3 * H), full2d),                   # packed Wq|Wk|Wv
            pl.BlockSpec((8, 3 * H), full2d),                   # packed biases / ln params
        ],
        out_specs=(
            pl.BlockSpec((TB, S, H), lambda b: (b, 0, 0)),
            pl.BlockSpec((TB, S, NUM_HEADS * S), lambda b: (b, 0, 0)),
        ),
        compiler_params=pltpu.CompilerParams(
            dimension_semantics=("parallel",),
            vmem_limit_bytes=32 * 1024 * 1024,
        ),
    )(ids2, mask3, pos, wtab, w_qkv, vecs)

    # layout plumbing only: unpack the lane-packed probs back to (B, NH, S, S)
    ctx = ctx[:B]
    probs = (probs_cat[:B]
             .reshape(B, S, NUM_HEADS, S)
             .transpose(0, 2, 1, 3))                                   # (B, NH, S, S)
    cls = ctx[:, 0, :]                                                  # context_layer[:, 0, :]
    return cls, ctx, probs


def reference_forward(x_seq, mask, params):
    """Pure-JAX reference reproducing the PyTorch forward exactly."""
    B, S = x_seq.shape
    words = jnp.take(params["word_emb"], x_seq, axis=0)
    pos = params["pos_emb"][:S][None, :, :]
    emb = words + pos
    mu = jnp.mean(emb, axis=-1, keepdims=True)
    var = jnp.mean((emb - mu) ** 2, axis=-1, keepdims=True)
    h = (emb - mu) / jnp.sqrt(var + LN_EPS) * params["ln_gamma"] + params["ln_beta"]

    def proj(w, b):
        y = jnp.einsum("bsh,hd->bsd", h, w) + b
        return y.reshape(B, S, NUM_HEADS, HEAD_DIM).transpose(0, 2, 1, 3)

    q = proj(params["wq"], params["bq"])
    k = proj(params["wk"], params["bk"])
    v = proj(params["wv"], params["bv"])
    scores = jnp.einsum("bhqd,bhkd->bhqk", q, k) / math.sqrt(HEAD_DIM)
    ext = (1.0 - mask.astype(jnp.float32))[:, None, None, :] * (-10000.0)
    scores = scores * ext
    probs = jax.nn.softmax(scores, axis=-1)
    ctx = jnp.einsum("bhqk,bhkd->bhqd", probs, v)
    ctx = ctx.transpose(0, 2, 1, 3).reshape(B, S, HID)
    return ctx[:, 0, :], ctx, probs


def make_params(key):
    ks = jax.random.split(key, 8)
    word_emb = jax.random.normal(ks[0], (VOCAB, HID), jnp.float32) * 0.02
    word_emb = word_emb.at[0].set(0.0)                     # padding_idx=0
    pos_emb = jax.random.normal(ks[1], (SEQ_LEN, HID), jnp.float32) * 0.02
    scale = 1.0 / math.sqrt(HID)
    return {
        "word_emb": word_emb,
        "pos_emb": pos_emb,
        # weights stored as (in, out) so the kernel computes x @ W + b
        "wq": jax.random.uniform(ks[2], (HID, HID), jnp.float32, -scale, scale),
        "wk": jax.random.uniform(ks[3], (HID, HID), jnp.float32, -scale, scale),
        "wv": jax.random.uniform(ks[4], (HID, HID), jnp.float32, -scale, scale),
        "bq": jax.random.uniform(ks[5], (HID,), jnp.float32, -scale, scale),
        "bk": jax.random.uniform(ks[6], (HID,), jnp.float32, -scale, scale),
        "bv": jax.random.uniform(ks[7], (HID,), jnp.float32, -scale, scale),
        "ln_gamma": jnp.ones((HID,), jnp.float32),
        "ln_beta": jnp.zeros((HID,), jnp.float32),
    }


if __name__ == "__main__":
    key = jax.random.PRNGKey(0)
    kp, kx, km = jax.random.split(key, 3)
    params = make_params(kp)

    B = 2
    x_seq = jax.random.randint(kx, (B, SEQ_LEN), 0, VOCAB, dtype=jnp.int32)
    # mask: 1 = real token, 0 = pad (make last two positions of batch 1 padded)
    mask = jnp.ones((B, SEQ_LEN), jnp.float32).at[1, -2:].set(0.0)

    cls, ctx, probs = jax.block_until_ready(seq_encoder_forward(x_seq, mask, params))

    cls_r, ctx_r, probs_r = reference_forward(x_seq, mask, params)
    assert jnp.allclose(ctx, ctx_r, atol=1e-3, rtol=1e-3)
    assert jnp.allclose(probs, probs_r, atol=1e-3, rtol=1e-3)
    assert jnp.allclose(cls, cls_r, atol=1e-3, rtol=1e-3)

    # TODO(synk): dropout layers are no-ops in eval mode and are intentionally omitted.
    print("KERNEL_OK")
</pallas_src>

<mosaic_0001>
module attributes {stable_mosaic.version = 11 : i64} {
  func.func @seq_encoder_kernel(%arg0: i32, %arg1: memref<16x1xi32, #tpu.memory_space<vmem>>, %arg2: memref<2x1x8xf32, #tpu.memory_space<vmem>>, %arg3: memref<8x32xf32, #tpu.memory_space<vmem>>, %arg4: memref<64x32xf32, #tpu.memory_space<vmem>>, %arg5: memref<32x96xf32, #tpu.memory_space<vmem>>, %arg6: memref<8x96xf32, #tpu.memory_space<vmem>>, %arg7: memref<2x8x32xf32, #tpu.memory_space<vmem>>, %arg8: memref<2x8x32xf32, #tpu.memory_space<vmem>>) attributes {dimension_semantics = [#tpu.dimension_semantics<parallel>], iteration_bounds = array<i64: 1>, scalar_prefetch = 0 : i64, scratch_operands = 0 : i64, tpu.core_type = #tpu.core_type<tc>, window_params = [{transform_indices = @transform_0, window_bounds = array<i64: 16, 1>}, {transform_indices = @transform_1, window_bounds = array<i64: 2, 1, 8>}, {pipeline_mode = #tpu.pipeline_mode<synchronous>, transform_indices = @transform_2, window_bounds = array<i64: 8, 32>}, {pipeline_mode = #tpu.pipeline_mode<synchronous>, transform_indices = @transform_3, window_bounds = array<i64: 64, 32>}, {pipeline_mode = #tpu.pipeline_mode<synchronous>, transform_indices = @transform_4, window_bounds = array<i64: 32, 96>}, {pipeline_mode = #tpu.pipeline_mode<synchronous>, transform_indices = @transform_5, window_bounds = array<i64: 8, 96>}, {transform_indices = @transform_6, window_bounds = array<i64: 2, 8, 32>}, {transform_indices = @transform_7, window_bounds = array<i64: 2, 8, 32>}]} {
    %c0 = arith.constant 0 : index
    %c0_0 = arith.constant 0 : index
    %0 = vector.load %arg1[%c0, %c0_0] : memref<16x1xi32, #tpu.memory_space<vmem>>, vector<16x1xi32>
    %1 = tpu.iota {dimensions = array<i32: 1>} : vector<16x64xi32>
    %2 = vector.broadcast %0 : vector<16x1xi32> to vector<16x64xi32>
    %3 = arith.cmpi eq, %2, %1 : vector<16x64xi32>
    %4 = arith.extui %3 : vector<16x64xi1> to vector<16x64xi32>
    %5 = arith.sitofp %4 : vector<16x64xi32> to vector<16x64xf32>
    %c0_1 = arith.constant 0 : index
    %c0_2 = arith.constant 0 : index
    %6 = vector.load %arg4[%c0_1, %c0_2] : memref<64x32xf32, #tpu.memory_space<vmem>>, vector<64x32xf32>
    %cst = arith.constant dense<0.000000e+00> : vector<16x32xf32>
    %7 = tpu.matmul %5, %6, %cst {dimension_numbers = #tpu.dot_dimension_numbers<[1], [0], [0], [1], [0, 0, 1, 1], [], []>} : vector<16x64xf32>, vector<64x32xf32>, vector<16x32xf32> -> vector<16x32xf32>
    %8 = vector.shape_cast %7 : vector<16x32xf32> to vector<2x8x32xf32>
    %c0_3 = arith.constant 0 : index
    %c0_4 = arith.constant 0 : index
    %9 = vector.load %arg3[%c0_3, %c0_4] : memref<8x32xf32, #tpu.memory_space<vmem>>, vector<8x32xf32>
    %10 = vector.shape_cast %9 : vector<8x32xf32> to vector<1x8x32xf32>
    %11 = vector.broadcast %10 : vector<1x8x32xf32> to vector<2x8x32xf32>
    %12 = arith.addf %8, %11 : vector<2x8x32xf32>
    %cst_5 = arith.constant dense<0.000000e+00> : vector<2x8xf32>
    %13 = vector.multi_reduction <add>, %12, %cst_5 [2] : vector<2x8x32xf32> to vector<2x8xf32>
    %14 = vector.shape_cast %13 : vector<2x8xf32> to vector<2x8x1xf32>
    %cst_6 = arith.constant 3.200000e+01 : f32
    %15 = vector.broadcast %cst_6 : f32 to vector<2x8x1xf32>
    %16 = arith.divf %14, %15 : vector<2x8x1xf32>
    %17 = vector.broadcast %16 : vector<2x8x1xf32> to vector<2x8x32xf32>
    %18 = arith.subf %12, %17 : vector<2x8x32xf32>
    %19 = arith.mulf %18, %18 : vector<2x8x32xf32>
    %cst_7 = arith.constant dense<0.000000e+00> : vector<2x8xf32>
    %20 = vector.multi_reduction <add>, %19, %cst_7 [2] : vector<2x8x32xf32> to vector<2x8xf32>
    %21 = vector.shape_cast %20 : vector<2x8xf32> to vector<2x8x1xf32>
    %cst_8 = arith.constant 3.200000e+01 : f32
    %22 = vector.broadcast %cst_8 : f32 to vector<2x8x1xf32>
    %23 = arith.divf %21, %22 : vector<2x8x1xf32>
    %cst_9 = arith.constant 9.99999974E-6 : f32
    %24 = vector.broadcast %cst_9 : f32 to vector<2x8x1xf32>
    %25 = arith.addf %23, %24 : vector<2x8x1xf32>
    %26 = math.rsqrt %25 : vector<2x8x1xf32>
    %27 = vector.broadcast %26 : vector<2x8x1xf32> to vector<2x8x32xf32>
    %28 = arith.mulf %18, %27 : vector<2x8x32xf32>
    %c1 = arith.constant 1 : index
    %c0_10 = arith.constant 0 : index
    %29 = vector.load %arg6[%c1, %c0_10] : memref<8x96xf32, #tpu.memory_space<vmem>>, vector<1x32xf32>
    %c2 = arith.constant 2 : index
    %c0_11 = arith.constant 0 : index
    %30 = vector.load %arg6[%c2, %c0_11] : memref<8x96xf32, #tpu.memory_space<vmem>>, vector<1x32xf32>
    %31 = vector.shape_cast %28 : vector<2x8x32xf32> to vector<16x32xf32>
    %32 = vector.broadcast %29 : vector<1x32xf32> to vector<16x32xf32>
    %33 = arith.mulf %31, %32 : vector<16x32xf32>
    %34 = vector.broadcast %30 : vector<1x32xf32> to vector<16x32xf32>
    %35 = arith.addf %33, %34 : vector<16x32xf32>
    %c0_12 = arith.constant 0 : index
    %c0_13 = arith.constant 0 : index
    %36 = vector.load %arg5[%c0_12, %c0_13] : memref<32x96xf32, #tpu.memory_space<vmem>>, vector<32x96xf32>
    %cst_14 = arith.constant dense<0.000000e+00> : vector<16x96xf32>
    %37 = tpu.matmul %35, %36, %cst_14 {dimension_numbers = #tpu.dot_dimension_numbers<[1], [0], [0], [1], [0, 0, 1, 1], [], []>} : vector<16x32xf32>, vector<32x96xf32>, vector<16x96xf32> -> vector<16x96xf32>
    %c0_15 = arith.constant 0 : index
    %c0_16 = arith.constant 0 : index
    %38 = vector.load %arg6[%c0_15, %c0_16] : memref<8x96xf32, #tpu.memory_space<vmem>>, vector<1x96xf32>
    %39 = vector.broadcast %38 : vector<1x96xf32> to vector<16x96xf32>
    %40 = arith.addf %37, %39 : vector<16x96xf32>
    %41 = vector.extract_strided_slice %40 {offsets = [0, 0], sizes = [16, 32], strides = [1, 1]} : vector<16x96xf32> to vector<16x32xf32>
    %42 = vector.shape_cast %41 : vector<16x32xf32> to vector<2x8x32xf32>
    %43 = vector.extract_strided_slice %40 {offsets = [0, 32], sizes = [16, 32], strides = [1, 1]} : vector<16x96xf32> to vector<16x32xf32>
    %44 = vector.shape_cast %43 : vector<16x32xf32> to vector<2x8x32xf32>
    %45 = vector.extract_strided_slice %40 {offsets = [0, 64], sizes = [16, 32], strides = [1, 1]} : vector<16x96xf32> to vector<16x32xf32>
    %46 = vector.shape_cast %45 : vector<16x32xf32> to vector<2x8x32xf32>
    %c0_17 = arith.constant 0 : index
    %c0_18 = arith.constant 0 : index
    %c0_19 = arith.constant 0 : index
    %47 = vector.load %arg2[%c0_17, %c0_18, %c0_19] : memref<2x1x8xf32, #tpu.memory_space<vmem>>, vector<2x1x8xf32>
    %cst_20 = arith.constant 1.000000e+00 : f32
    %48 = vector.broadcast %cst_20 : f32 to vector<2x1x8xf32>
    %49 = arith.subf %48, %47 : vector<2x1x8xf32>
    %cst_21 = arith.constant -1.000000e+04 : f32
    %50 = vector.broadcast %cst_21 : f32 to vector<2x1x8xf32>
    %51 = arith.mulf %49, %50 : vector<2x1x8xf32>
    %52 = vector.extract_strided_slice %42 {offsets = [0, 0, 0], sizes = [2, 8, 8], strides = [1, 1, 1]} : vector<2x8x32xf32> to vector<2x8x8xf32>
    %53 = vector.extract_strided_slice %44 {offsets = [0, 0, 0], sizes = [2, 8, 8], strides = [1, 1, 1]} : vector<2x8x32xf32> to vector<2x8x8xf32>
    %54 = vector.extract_strided_slice %46 {offsets = [0, 0, 0], sizes = [2, 8, 8], strides = [1, 1, 1]} : vector<2x8x32xf32> to vector<2x8x8xf32>
    "tpu.trace_start"() <{level = 10 : i32, message = "bqd,bkd->bqk"}> : () -> ()
    %cst_22 = arith.constant dense<0.000000e+00> : vector<2x8x8xf32>
    %55 = tpu.matmul %52, %53, %cst_22 {dimension_numbers = #tpu.dot_dimension_numbers<[2], [2], [1], [1], [0, 0, 0, 1, 1, 1], [0], [0]>} : vector<2x8x8xf32>, vector<2x8x8xf32>, vector<2x8x8xf32> -> vector<2x8x8xf32>
    "tpu.trace_stop"() : () -> ()
    %cst_23 = arith.constant 0.353553385 : f32
    %56 = vector.broadcast %cst_23 : f32 to vector<2x8x8xf32>
    %57 = arith.mulf %55, %56 : vector<2x8x8xf32>
    %58 = vector.broadcast %51 : vector<2x1x8xf32> to vector<2x8x8xf32>
    %59 = arith.mulf %57, %58 : vector<2x8x8xf32>
    %cst_24 = arith.constant dense<0xFF800000> : vector<2x8xf32>
    %60 = vector.multi_reduction <maximumf>, %59, %cst_24 [2] : vector<2x8x8xf32> to vector<2x8xf32>
    %61 = vector.shape_cast %60 : vector<2x8xf32> to vector<2x8x1xf32>
    %62 = vector.broadcast %61 : vector<2x8x1xf32> to vector<2x8x8xf32>
    %63 = arith.subf %59, %62 : vector<2x8x8xf32>
    %64 = math.exp %63 : vector<2x8x8xf32>
    %cst_25 = arith.constant dense<0.000000e+00> : vector<2x8xf32>
    %65 = vector.multi_reduction <add>, %64, %cst_25 [2] : vector<2x8x8xf32> to vector<2x8xf32>
    %66 = vector.shape_cast %65 : vector<2x8xf32> to vector<2x8x1xf32>
    %67 = vector.broadcast %66 : vector<2x8x1xf32> to vector<2x8x8xf32>
    %68 = arith.divf %64, %67 : vector<2x8x8xf32>
    "tpu.trace_start"() <{level = 10 : i32, message = "bqk,bkd->bqd"}> : () -> ()
    %cst_26 = arith.constant dense<0.000000e+00> : vector<2x8x8xf32>
    %69 = tpu.matmul %68, %54, %cst_26 {dimension_numbers = #tpu.dot_dimension_numbers<[2], [1], [1], [2], [0, 0, 0, 1, 1, 2], [0], [0]>} : vector<2x8x8xf32>, vector<2x8x8xf32>, vector<2x8x8xf32> -> vector<2x8x8xf32>
    "tpu.trace_stop"() : () -> ()
    %70 = vector.extract_strided_slice %42 {offsets = [0, 0, 8], sizes = [2, 8, 8], strides = [1, 1, 1]} : vector<2x8x32xf32> to vector<2x8x8xf32>
    %71 = vector.extract_strided_slice %44 {offsets = [0, 0, 8], sizes = [2, 8, 8], strides = [1, 1, 1]} : vector<2x8x32xf32> to vector<2x8x8xf32>
    %72 = vector.extract_strided_slice %46 {offsets = [0, 0, 8], sizes = [2, 8, 8], strides = [1, 1, 1]} : vector<2x8x32xf32> to vector<2x8x8xf32>
    "tpu.trace_start"() <{level = 10 : i32, message = "bqd,bkd->bqk"}> : () -> ()
    %cst_27 = arith.constant dense<0.000000e+00> : vector<2x8x8xf32>
    %73 = tpu.matmul %70, %71, %cst_27 {dimension_numbers = #tpu.dot_dimension_numbers<[2], [2], [1], [1], [0, 0, 0, 1, 1, 1], [0], [0]>} : vector<2x8x8xf32>, vector<2x8x8xf32>, vector<2x8x8xf32> -> vector<2x8x8xf32>
    "tpu.trace_stop"() : () -> ()
    %cst_28 = arith.constant 0.353553385 : f32
    %74 = vector.broadcast %cst_28 : f32 to vector<2x8x8xf32>
    %75 = arith.mulf %73, %74 : vector<2x8x8xf32>
    %76 = vector.broadcast %51 : vector<2x1x8xf32> to vector<2x8x8xf32>
    %77 = arith.mulf %75, %76 : vector<2x8x8xf32>
    %cst_29 = arith.constant dense<0xFF800000> : vector<2x8xf32>
    %78 = vector.multi_reduction <maximumf>, %77, %cst_29 [2] : vector<2x8x8xf32> to vector<2x8xf32>
    %79 = vector.shape_cast %78 : vector<2x8xf32> to vector<2x8x1xf32>
    %80 = vector.broadcast %79 : vector<2x8x1xf32> to vector<2x8x8xf32>
    %81 = arith.subf %77, %80 : vector<2x8x8xf32>
    %82 = math.exp %81 : vector<2x8x8xf32>
    %cst_30 = arith.constant dense<0.000000e+00> : vector<2x8xf32>
    %83 = vector.multi_reduction <add>, %82, %cst_30 [2] : vector<2x8x8xf32> to vector<2x8xf32>
    %84 = vector.shape_cast %83 : vector<2x8xf32> to vector<2x8x1xf32>
    %85 = vector.broadcast %84 : vector<2x8x1xf32> to vector<2x8x8xf32>
    %86 = arith.divf %82, %85 : vector<2x8x8xf32>
    "tpu.trace_start"() <{level = 10 : i32, message = "bqk,bkd->bqd"}> : () -> ()
    %cst_31 = arith.constant dense<0.000000e+00> : vector<2x8x8xf32>
    %87 = tpu.matmul %86, %72, %cst_31 {dimension_numbers = #tpu.dot_dimension_numbers<[2], [1], [1], [2], [0, 0, 0, 1, 1, 2], [0], [0]>} : vector<2x8x8xf32>, vector<2x8x8xf32>, vector<2x8x8xf32> -> vector<2x8x8xf32>
    "tpu.trace_stop"() : () -> ()
    %88 = vector.extract_strided_slice %42 {offsets = [0, 0, 16], sizes = [2, 8, 8], strides = [1, 1, 1]} : vector<2x8x32xf32> to vector<2x8x8xf32>
    %89 = vector.extract_strided_slice %44 {offsets = [0, 0, 16], sizes = [2, 8, 8], strides = [1, 1, 1]} : vector<2x8x32xf32> to vector<2x8x8xf32>
    %90 = vector.extract_strided_slice %46 {offsets = [0, 0, 16], sizes = [2, 8, 8], strides = [1, 1, 1]} : vector<2x8x32xf32> to vector<2x8x8xf32>
    "tpu.trace_start"() <{level = 10 : i32, message = "bqd,bkd->bqk"}> : () -> ()
    %cst_32 = arith.constant dense<0.000000e+00> : vector<2x8x8xf32>
    %91 = tpu.matmul %88, %89, %cst_32 {dimension_numbers = #tpu.dot_dimension_numbers<[2], [2], [1], [1], [0, 0, 0, 1, 1, 1], [0], [0]>} : vector<2x8x8xf32>, vector<2x8x8xf32>, vector<2x8x8xf32> -> vector<2x8x8xf32>
    "tpu.trace_stop"() : () -> ()
    %cst_33 = arith.constant 0.353553385 : f32
    %92 = vector.broadcast %cst_33 : f32 to vector<2x8x8xf32>
    %93 = arith.mulf %91, %92 : vector<2x8x8xf32>
    %94 = vector.broadcast %51 : vector<2x1x8xf32> to vector<2x8x8xf32>
    %95 = arith.mulf %93, %94 : vector<2x8x8xf32>
    %cst_34 = arith.constant dense<0xFF800000> : vector<2x8xf32>
    %96 = vector.multi_reduction <maximumf>, %95, %cst_34 [2] : vector<2x8x8xf32> to vector<2x8xf32>
    %97 = vector.shape_cast %96 : vector<2x8xf32> to vector<2x8x1xf32>
    %98 = vector.broadcast %97 : vector<2x8x1xf32> to vector<2x8x8xf32>
    %99 = arith.subf %95, %98 : vector<2x8x8xf32>
    %100 = math.exp %99 : vector<2x8x8xf32>
    %cst_35 = arith.constant dense<0.000000e+00> : vector<2x8xf32>
    %101 = vector.multi_reduction <add>, %100, %cst_35 [2] : vector<2x8x8xf32> to vector<2x8xf32>
    %102 = vector.shape_cast %101 : vector<2x8xf32> to vector<2x8x1xf32>
    %103 = vector.broadcast %102 : vector<2x8x1xf32> to vector<2x8x8xf32>
    %104 = arith.divf %100, %103 : vector<2x8x8xf32>
    "tpu.trace_start"() <{level = 10 : i32, message = "bqk,bkd->bqd"}> : () -> ()
    %cst_36 = arith.constant dense<0.000000e+00> : vector<2x8x8xf32>
    %105 = tpu.matmul %104, %90, %cst_36 {dimension_numbers = #tpu.dot_dimension_numbers<[2], [1], [1], [2], [0, 0, 0, 1, 1, 2], [0], [0]>} : vector<2x8x8xf32>, vector<2x8x8xf32>, vector<2x8x8xf32> -> vector<2x8x8xf32>
    "tpu.trace_stop"() : () -> ()
    %106 = vector.extract_strided_slice %42 {offsets = [0, 0, 24], sizes = [2, 8, 8], strides = [1, 1, 1]} : vector<2x8x32xf32> to vector<2x8x8xf32>
    %107 = vector.extract_strided_slice %44 {offsets = [0, 0, 24], sizes = [2, 8, 8], strides = [1, 1, 1]} : vector<2x8x32xf32> to vector<2x8x8xf32>
    %108 = vector.extract_strided_slice %46 {offsets = [0, 0, 24], sizes = [2, 8, 8], strides = [1, 1, 1]} : vector<2x8x32xf32> to vector<2x8x8xf32>
    "tpu.trace_start"() <{level = 10 : i32, message = "bqd,bkd->bqk"}> : () -> ()
    %cst_37 = arith.constant dense<0.000000e+00> : vector<2x8x8xf32>
    %109 = tpu.matmul %106, %107, %cst_37 {dimension_numbers = #tpu.dot_dimension_numbers<[2], [2], [1], [1], [0, 0, 0, 1, 1, 1], [0], [0]>} : vector<2x8x8xf32>, vector<2x8x8xf32>, vector<2x8x8xf32> -> vector<2x8x8xf32>
    "tpu.trace_stop"() : () -> ()
    %cst_38 = arith.constant 0.353553385 : f32
    %110 = vector.broadcast %cst_38 : f32 to vector<2x8x8xf32>
    %111 = arith.mulf %109, %110 : vector<2x8x8xf32>
    %112 = vector.broadcast %51 : vector<2x1x8xf32> to vector<2x8x8xf32>
    %113 = arith.mulf %111, %112 : vector<2x8x8xf32>
    %cst_39 = arith.constant dense<0xFF800000> : vector<2x8xf32>
    %114 = vector.multi_reduction <maximumf>, %113, %cst_39 [2] : vector<2x8x8xf32> to vector<2x8xf32>
    %115 = vector.shape_cast %114 : vector<2x8xf32> to vector<2x8x1xf32>
    %116 = vector.broadcast %115 : vector<2x8x1xf32> to vector<2x8x8xf32>
    %117 = arith.subf %113, %116 : vector<2x8x8xf32>
    %118 = math.exp %117 : vector<2x8x8xf32>
    %cst_40 = arith.constant dense<0.000000e+00> : vector<2x8xf32>
    %119 = vector.multi_reduction <add>, %118, %cst_40 [2] : vector<2x8x8xf32> to vector<2x8xf32>
    %120 = vector.shape_cast %119 : vector<2x8xf32> to vector<2x8x1xf32>
    %121 = vector.broadcast %120 : vector<2x8x1xf32> to vector<2x8x8xf32>
    %122 = arith.divf %118, %121 : vector<2x8x8xf32>
    "tpu.trace_start"() <{level = 10 : i32, message = "bqk,bkd->bqd"}> : () -> ()
    %cst_41 = arith.constant dense<0.000000e+00> : vector<2x8x8xf32>
    %123 = tpu.matmul %122, %108, %cst_41 {dimension_numbers = #tpu.dot_dimension_numbers<[2], [1], [1], [2], [0, 0, 0, 1, 1, 2], [0], [0]>} : vector<2x8x8xf32>, vector<2x8x8xf32>, vector<2x8x8xf32> -> vector<2x8x8xf32>
    "tpu.trace_stop"() : () -> ()
    %124 = tpu.concatenate %69, %87, %105, %123 in 2 : vector<2x8x8xf32>, vector<2x8x8xf32>, vector<2x8x8xf32>, vector<2x8x8xf32> -> vector<2x8x32xf32>
    %c0_42 = arith.constant 0 : index
    %c0_43 = arith.constant 0 : index
    %c0_44 = arith.constant 0 : index
    %125 = vector.load %arg7[%c0_42, %c0_43, %c0_44] : memref<2x8x32xf32, #tpu.memory_space<vmem>>, vector<2x8x32xf32>
    tpu.vector_store %arg7[%c0_42, %c0_43, %c0_44], %124 {strides = array<i32>} : memref<2x8x32xf32, #tpu.memory_space<vmem>>, vector<2x8x32xf32>,
    %126 = tpu.concatenate %68, %86, %104, %122 in 2 : vector<2x8x8xf32>, vector<2x8x8xf32>, vector<2x8x8xf32>, vector<2x8x8xf32> -> vector<2x8x32xf32>
    %c0_45 = arith.constant 0 : index
    %c0_46 = arith.constant 0 : index
    %c0_47 = arith.constant 0 : index
    %127 = vector.load %arg8[%c0_45, %c0_46, %c0_47] : memref<2x8x32xf32, #tpu.memory_space<vmem>>, vector<2x8x32xf32>
    tpu.vector_store %arg8[%c0_45, %c0_46, %c0_47], %126 {strides = array<i32>} : memref<2x8x32xf32, #tpu.memory_space<vmem>>, vector<2x8x32xf32>,
    return
  }
  func.func @transform_0(%arg0: i32) -> (i32, i32) {
    %c0_i32 = arith.constant 0 : i32
    %c0_i32_0 = arith.constant 0 : i32
    return %arg0, %c0_i32 : i32, i32
  }
  func.func @transform_1(%arg0: i32) -> (i32, i32, i32) {
    %c0_i32 = arith.constant 0 : i32
    %c0_i32_0 = arith.constant 0 : i32
    %c0_i32_1 = arith.constant 0 : i32
    return %arg0, %c0_i32, %c0_i32_0 : i32, i32, i32
  }
  func.func @transform_2(%arg0: i32) -> (i32, i32) {
    %c0_i32 = arith.constant 0 : i32
    %c0_i32_0 = arith.constant 0 : i32
    %c0_i32_1 = arith.constant 0 : i32
    return %c0_i32, %c0_i32_0 : i32, i32
  }
  func.func @transform_3(%arg0: i32) -> (i32, i32) {
    %c0_i32 = arith.constant 0 : i32
    %c0_i32_0 = arith.constant 0 : i32
    %c0_i32_1 = arith.constant 0 : i32
    return %c0_i32, %c0_i32_0 : i32, i32
  }
  func.func @transform_4(%arg0: i32) -> (i32, i32) {
    %c0_i32 = arith.constant 0 : i32
    %c0_i32_0 = arith.constant 0 : i32
    %c0_i32_1 = arith.constant 0 : i32
    return %c0_i32, %c0_i32_0 : i32, i32
  }
  func.func @transform_5(%arg0: i32) -> (i32, i32) {
    %c0_i32 = arith.constant 0 : i32
    %c0_i32_0 = arith.constant 0 : i32
    %c0_i32_1 = arith.constant 0 : i32
    return %c0_i32, %c0_i32_0 : i32, i32
  }
  func.func @transform_6(%arg0: i32) -> (i32, i32, i32) {
    %c0_i32 = arith.constant 0 : i32
    %c0_i32_0 = arith.constant 0 : i32
    %c0_i32_1 = arith.constant 0 : i32
    return %arg0, %c0_i32, %c0_i32_0 : i32, i32, i32
  }
  func.func @transform_7(%arg0: i32) -> (i32, i32, i32) {
    %c0_i32 = arith.constant 0 : i32
    %c0_i32_0 = arith.constant 0 : i32
    %c0_i32_1 = arith.constant 0 : i32
    return %arg0, %c0_i32, %c0_i32_0 : i32, i32, i32
  }
}

</mosaic_0001>

<bundles_post_ra>
// kernel: tpu_custom_call.1
= control target key start
LH: loop header
LB: loop body
LE: loop exit
PB: predicated region body
PF: predicated region fallthrough
CT: control target
= control target key end

     0   :  { %13 = vsyncpa [#allocation3], 0  ;;  %v2033_v2 = vmov 0   ;;  %s2365_s0 = inlined_call_operand.vmem [shape: s32[16,1], index: 0, kind: input, shape index: {}]   ;;  %s2366_s1 = inlined_call_operand.vmem [shape: f32[2,1,8], index: 1, kind: input, shape index: {}]   ;;  %s2367_s2 = inlined_call_operand.vmem [shape: f32[8,32], index: 2, kind: input, shape index: {}]   ;;  %s2368_s3 = inlined_call_operand.vmem [shape: f32[64,32], index: 3, kind: input, shape index: {}]   ;;  %s2369_s4 = inlined_call_operand.vmem [shape: f32[32,96], index: 4, kind: input, shape index: {}]   ;;  %s2370_s5 = inlined_call_operand.vmem [shape: f32[8,96], index: 5, kind: input, shape index: {}]   ;;  %s2371_s6 = inlined_call_operand.hbm [shape: f32[2,8,32], index: 6, kind: output, shape index: {0}]   ;;  %s2372_s7 = inlined_call_operand.hbm [shape: f32[2,8,32], index: 7, kind: output, shape index: {1}]  }
   0x1   :  { %v27_v0 = vld [vmem:[%s2365_s0] sm:$0xff]  ;;  %1948 = vset.pattern.permute.xlu0 %v2033_v2  ;;  %v44_v3 = vld [vmem:[%s2368_s3 + $0x8] sm:$0xff]  ;;  %v45_v4 = vld [vmem:[%s2368_s3 + $0x10] sm:$0xff] }
   0x2   :  { %v43_v1 = vld [vmem:[%s2368_s3] sm:$0xff]  ;;  %v46_v5 = vld [vmem:[%s2368_s3 + $0x18] sm:$0xff]  ;;  %32 = vperm.xlu0 %1948, %v27_v0   ;;  %v28_v8 = vld [vmem:[%s2365_s0 + $0x8] sm:$0xff] }
   0x3   :  { %v1904_v6 = vpack.c.bf16 %v44_v3, %v43_v1  ;;  %v1908_v7 = vpack.c.bf16 %v46_v5, %v45_v4  ;;  %v47_v9 = vld [vmem:[%s2368_s3 + $0x20] sm:$0xff]  ;;  %v48_v10 = vld [vmem:[%s2368_s3 + $0x28] sm:$0xff] }
   0x5   :  { %1905 = vmatprep.subr.bf16.mxu0 %v1904_v6 }
   0x6   :  { %14 = vsyncpa [#allocation5], 0  ;;  %1907 = vmatpush3.bf16.msra.mxu0 %v1904_v6  ;;  %35 = vperm.xlu0 %1948, %v28_v8   ;;  %v1912_v11 = vpack.c.bf16 %v48_v10, %v47_v9  ;;  %v49_v12 = vld [vmem:[%s2368_s3 + $0x30] sm:$0xff]  ;;  %v50_v13 = vld [vmem:[%s2368_s3 + $0x38] sm:$0xff]  ;;  %v2034_v15 = vmov 0.0   ;;  %v29_v16 = vlaneseq  ;;  %vm51_vm0 = vcmask 523264  }
   0x7   :  { %1909 = vmatprep.subr.bf16.mxu0 %v1908_v7  ;;  %v1916_v14 = vpack.c.bf16 %v50_v13, %v49_v12  ;;  %v133_v22 = vld [vmem:[%s2367_s2] sm:$0xff]  ;;  %vm136_vm3 = vcmask 261120   ;;  %v179_v40 = vld [vmem:[%s2369_s4 + $0x8] sm:$0xff]  ;;  %v180_v41 = vld [vmem:[%s2369_s4 + $0x10] sm:$0xff]  ;;  %vm2035_vm4 = vmmov 0   ;;  %s2036_s10 = smov 96  }
   0x8   :  { %v30_v17 = vand.u32 127, %v29_v16  ;;  %v178_v39 = vld [vmem:[%s2369_s4] sm:$0xff]  ;;  %v181_v43 = vld [vmem:[%s2369_s4 + $0x18] sm:$0xff]  ;;  %vm277_vm5 = vcmask 64512   ;;  %v434_v6 = vshrl.u32 %v29_v16, 7  ;;  %s2038_s14 = smov 88  }
   0x9   :  { %v1920_v42 = vpack.c.bf16 %v179_v40, %v178_v39  ;;  %v1924_v44 = vpack.c.bf16 %v181_v43, %v180_v41  ;;  %v1717_v52 = vld [vmem:[%s2370_s5 + $0x1] ss:$0 sm:$0xff]  ;;  %v1718_v54 = vld [vmem:[%s2370_s5 + $0x2] ss:$0 sm:$0xff]  ;;  %v1719_v61 = vld [vmem:[%s2370_s5] ss:$0 sm:$0xff] }
   0xa   :  { %1911 = vmatpush3.bf16.msra.mxu0 %v1908_v7  ;;  %v268_v4 = vld [vmem:[%s2366_s1] sm:$0x1]  ;;  %v269_v7 = vld [vmem:[%s2366_s1 + $0x1] sm:$0x1]  ;;  %v435_v10 = vsub.s32 0, %v434_v6  ;;  %s2037_s1 = smov 64  }
   0xb   :  { %1913 = vmatprep.subr.bf16.mxu0 %v1912_v11  ;;  %1921 = vmatprep.subr.bf16.mxu1 %v1920_v42  ;;  %v270_v5 = vsub.f32 1.0, %v268_v4  ;;  %v271_v8 = vsub.f32 1.0, %v269_v7  ;;  %s2039_s15 = smov 120   ;;  %s2040_s16 = smov 56   ;;  %vm1650_vm6 = vcmask 195584   ;;  %vm1647_vm7 = vcmask 130048  }
   0xc   :  { %1923 = vmatpush3.bf16.msra.mxu1 %v1920_v42  ;;  %s2041_s17 = smov 80   ;;  %s2042_s18 = smov 112  }
   0xd   :  { %1925 = vmatprep.subr.bf16.mxu1 %v1924_v44  ;;  %v272_v9 = vmul.f32 -10000.0, %v270_v5  ;;  %s2043_s19 = smov 48   ;;  %s2044_s0 = smov 72  }
   0xe   :  { %1915 = vmatpush3.bf16.msra.mxu0 %v1912_v11  ;;  %v273_v11 = vmul.f32 -10000.0, %v271_v8  ;;  %s2045_s3 = smov 104   ;;  %s2046_s20 = smov 40  }
   0xf   :  { %1917 = vmatprep.subr.bf16.mxu0 %v1916_v14  ;;  %v2187_v12 = vrot.slane %v272_v9, %v435_v10  ;;  %s2047_s2 = smov 8   ;;  %s2048_s21 = smov 16  }
  0x10   :  { %1927 = vmatpush3.bf16.msra.mxu1 %v1924_v44  ;;  %s2049_s22 = smov 24   ;;  %s2050_s23 = smov [#allocation2]  }
  0x11   :  { %1824 = vmatprep.subr.mxu1 %v2034_v15  ;;  %s1686_s24 = sshll.u32 %s2050_s23, 4  ;;  %s2051_s25 = smov [#allocation4]   ;;  %s1687_s24 = int_to_ptr.vmem [resolvable:$true] %s1686_s24 }
  0x12   :  { %1919 = vmatpush3.bf16.msra.mxu0 %v1916_v14  ;;  %s1698_s26 = sshll.u32 %s2051_s25, 4  ;;  %s1985_s27 = scalar_lea.vmem %s1687_s24, 256  ;;  %s1699_s26 = int_to_ptr.vmem [resolvable:$true] %s1698_s26 }
  0x13   :  { %1834 = vmatprep.subr.mxu0 %v2034_v15  ;;  %p1986_p0 = scmp.ne.s32.totalorder %s1687_s24, %s1985_s27  ;;  %p1990_p1 = scmp.lt.s32.totalorder %s1687_s24, %s1687_s24 }
  0x14   :  { %p1991_p2 = scmp.lt.s32.totalorder %s1985_s27, %s1985_s27 }
  0x16   :  { %p1992_p3 = por %p1991_p2, %p1990_p1 }
  0x18   :  { %p1993_p4 = pnand %p1992_p3, %p1986_p0 }
  0x81   :  { %v33_v18 = vpop.permute.xlu0 %32 }
  0x82   :  { %vm37_vm1 = vcmp.eq.s32.totalorder %v33_v18, %v30_v17  ;;  %v2189_v18 = vrot.slane %v273_v11, %v435_v10 }
  0x83   :  { %v1713_v19 = vsel %vm37_vm1, 1.0, %v2034_v15 }
  0x84   :  { %1810 = vmatprep.mubr.msk.f32.mxu0 %vm51_vm0, %v1713_v19 }
  0x85   :  { %v36_v20 = vpop.permute.xlu0 %35 }
  0x86   :  { %vm38_vm2 = vcmp.eq.s32.totalorder %v36_v20, %v30_v17 }
  0x87   :  { %v1714_v21 = vsel %vm38_vm2, 1.0, %v2034_v15 }
  0x88   :  { %1811 = vmatmul.mubr.msk.f32.vlgmr.msra.gmra.mrb[0].mxu0 %vm51_vm0, %v1714_v21 }
  0x89   :  { %1836 = vmatprep.mubr.msk.f32.mxu0 %vm2035_vm4, %v2034_v15 }
 0x15b   :  { %v1812_v23 = vpop.f32.mrb[0].mxu0 }
 0x15c   :  { %v124_v24 = vpop.f32.mrb[1].mxu0  ;;  %v135_v26 = vadd.f32 %v1812_v23, %v133_v22 }
 0x15d   :  { %v134_v25 = vadd.f32 %v133_v22, %v124_v24 }
 0x15e   :  { %v140_v28 = vsel %vm136_vm3, %v135_v26, 0.0 }
 0x15f   :  { %v137_v27 = vsel %vm136_vm3, %v134_v25, 0.0 }
 0x160   :  { %138 = vadd.xlane.f32.xlu1 %v137_v27 }
 0x164   :  { %141 = vadd.xlane.f32.xlu1 %v140_v28 }
 0x1ed   :  { %v139_v29 = vpop.xlane.xlu1 %138 }
 0x1ee   :  { %v144_v30 = vmul.f32 0.03125, %v139_v29 }
 0x1f0   :  { %v146_v31 = vsub.f32 %v134_v25, %v144_v30 }
 0x1f1   :  { %v142_v32 = vpop.xlane.xlu1 %141 }
 0x1f2   :  { %v145_v33 = vmul.f32 0.03125, %v142_v32  ;;  %v148_v34 = vmul.f32 %v146_v31, %v146_v31 }
 0x1f4   :  { %v147_v35 = vsub.f32 %v135_v26, %v145_v33  ;;  %v150_v36 = vsel %vm136_vm3, %v148_v34, 0.0 }
 0x1f5   :  { %151 = vadd.xlane.f32.xlu0 %v150_v36 }
 0x1f6   :  { %v149_v37 = vmul.f32 %v147_v35, %v147_v35 }
 0x1f8   :  { %v153_v38 = vsel %vm136_vm3, %v149_v37, 0.0 }
 0x1f9   :  { %154 = vadd.xlane.f32.xlu1 %v153_v38 }
 0x282   :  { %v152_v45 = vpop.xlane.xlu0 %151 }
 0x283   :  { %v156_v46 = vmul.f32 0.03125, %v152_v45 }
 0x285   :  { %v158_v47 = vadd.f32 1e-05, %v156_v46 }
 0x286   :  { %v155_v48 = vpop.xlane.xlu1 %154 }
 0x287   :  { %1949 = vrsqrt.f32 %v158_v47  ;;  %v157_v49 = vmul.f32 0.03125, %v155_v48 }
 0x289   :  { %v159_v50 = vadd.f32 1e-05, %v157_v49 }
 0x28b   :  { %1951 = vrsqrt.f32 %v159_v50 }
 0x291   :  { %v1950_v51 = vpop.eup %1949 }
 0x292   :  { %v162_v53 = vmul.f32 %v1950_v51, %v146_v31 }
 0x294   :  { %v170_v55 = vmul.f32 %v1717_v52, %v162_v53 }
 0x295   :  { %v1952_v56 = vpop.eup %1951 }
 0x296   :  { %v163_v57 = vmul.f32 %v1952_v56, %v147_v35  ;;  %v176_v58 = vadd.f32 %v1718_v54, %v170_v55 }
 0x298   :  { %v171_v59 = vmul.f32 %v1717_v52, %v163_v57  ;;  %1821 = vmatprep.mubr.msk.f32.mxu1 %vm136_vm3, %v176_v58 }
 0x29a   :  { %v177_v60 = vadd.f32 %v1718_v54, %v171_v59 }
 0x29c   :  { %1822 = vmatmul.mubr.msk.f32.vlgmr.msra.gmra.mrb[0].mxu1 %vm136_vm3, %v177_v60 }
 0x29d   :  { %1826 = vmatprep.mubr.msk.f32.mxu1 %vm2035_vm4, %v2034_v15 }
 0x36f   :  { %v1823_v62 = vpop.f32.mrb[0].mxu1 }
 0x370   :  { %v259_v63 = vpop.f32.mrb[1].mxu1  ;;  %v2165_v1 = vadd.f32 %v1823_v62, %v1719_v61 }
 0x371   :  { %v2162_v0 = vadd.f32 %v1719_v61, %v259_v63 }
 0x373   :  { %275 = vrot.lane.b32.xlu1 %v2162_v0, %s2036_s10 }
 0x377   :  { %353 = vrot.lane.b32.xlu1 %v2165_v1, %s2036_s10 }
 0x3e5   :  { %v276_v2 = vpop.permute.xlu1 %275 }
 0x3e6   :  { %1825 = vmatpush3.xpose.msk.msra.mxu1 %vm277_vm5, %v276_v2 }
 0x3e7   :  { %1829 = vmatprep.subr.mxu1 %v2034_v15 }
 0x3e9   :  { %1827 = vmatmul.mubr.msk.f32.vlgmr.msra.gmra.mrb[2].mxu1 %vm277_vm5, %v2162_v0  ;;  %v354_v3 = vpop.permute.xlu1 %353 }
 0x3ea   :  { %1830 = vmatpush3.xpose.msk.msra.mxu1 %vm277_vm5, %v354_v3  ;;  %1831 = vmatprep.mubr.msk.f32.mxu1 %vm2035_vm4, %v2034_v15 }
 0x3eb   :  { %1839 = vmatprep.subr.mxu1 %v2034_v15 }
 0x3ed   :  { %1832 = vmatmul.mubr.msk.f32.vlgmr.msra.gmra.mrb[4].mxu1 %vm277_vm5, %v2165_v1 }
 0x3ee   :  { %1841 = vmatprep.mubr.msk.f32.mxu1 %vm2035_vm4, %v2034_v15 }
 0x4bc   :  { %v348_v13 = vpop.f32.mrb[2].mxu1 }
 0x4bd   :  { %v429_v14 = vmul.f32 0.35355338, %v348_v13  ;;  %v1828_v17 = vpop.f32.mrb[3].mxu1 }
 0x4bf   :  { %v443_v19 = vmul.f32 %v2187_v12, %v429_v14 }
 0x4c0   :  { %v425_v20 = vpop.f32.mrb[4].mxu1 }
 0x4c1   :  { %v430_v21 = vmul.f32 0.35355338, %v425_v20  ;;  %v1833_v16 = vpop.f32.mrb[5].mxu1  ;;  %v445_v22 = vsel %vm277_vm5, %v443_v19, -inf }
 0x4c2   :  { %446 = vmax.xlane.f32.xlu1 %v445_v22 }
 0x4c3   :  { %v444_v23 = vmul.f32 %v2189_v18, %v430_v21 }
 0x4c5   :  { %v448_v24 = vsel %vm277_vm5, %v444_v23, -inf }
 0x4c6   :  { %449 = vmax.xlane.f32.xlu0 %v448_v24 }
 0x4d3   :  { %543 = vrot.lane.b32.xlu1 %v2165_v1, %s2037_s1 }
 0x4dc   :  { %467 = vrot.lane.b32.xlu0 %v2162_v0, %s2037_s1 }
 0x4e0   :  { %621 = vrot.lane.b32.xlu0 %v2162_v0, %s2038_s14 }
 0x4e4   :  { %699 = vrot.lane.b32.xlu0 %v2165_v1, %s2038_s14 }
 0x4e8   :  { %619 = vrot.lane.b32.xlu0 %v2162_v0, %s2039_s15 }
 0x54f   :  { %v447_v25 = vpop.xlane.xlu1 %446 }
 0x550   :  { %v451_v26 = vsub.f32 %v443_v19, %v447_v25 }
 0x552   :  { %v453_v27 = vmul.f32 1.442695, %v451_v26 }
 0x553   :  { %v450_v28 = vpop.xlane.xlu0 %449  ;;  %v544_v29 = vpop.permute.xlu1 %543 }
 0x554   :  { %1953 = vpow2.f32 %v453_v27  ;;  %v452_v30 = vsub.f32 %v444_v23, %v450_v28  ;;  %1840 = vmatpush3.msra.mxu1 %v544_v29 }
 0x555   :  { %1849 = vmatprep.subr.mxu1 %v2034_v15 }
 0x556   :  { %v455_v31 = vmul.f32 1.442695, %v452_v30 }
 0x557   :  { %v468_v32 = vpop.permute.xlu0 %467 }
 0x558   :  { %1955 = vpow2.f32 %v455_v31  ;;  %1835 = vmatpush3.msra.mxu0 %v468_v32 }
 0x559   :  { %1844 = vmatprep.subr.mxu0 %v2034_v15 }
 0x55b   :  { %v622_v37 = vpop.permute.xlu0 %621 }
 0x55e   :  { %v1954_v33 = vpop.eup %1953 }
 0x55f   :  { %v457_v34 = vsel %vm277_vm5, %v1954_v33, 0.0  ;;  %v700_v38 = vpop.permute.xlu0 %699 }
 0x560   :  { %458 = vadd.xlane.f32.xlu0 %v457_v34 }
 0x562   :  { %v1956_v35 = vpop.eup %1955 }
 0x563   :  { %v460_v36 = vsel %vm277_vm5, %v1956_v35, 0.0  ;;  %v620_v39 = vpop.permute.xlu0 %619 }
 0x564   :  { %461 = vadd.xlane.f32.xlu0 %v460_v36 }
 0x57a   :  { %697 = vrot.lane.b32.xlu0 %v2165_v1, %s2039_s15 }
 0x5ed   :  { %v459_v40 = vpop.xlane.xlu0 %458 }
 0x5ee   :  { %1957 = vrcp.f32 %v459_v40 }
 0x5f1   :  { %v462_v41 = vpop.xlane.xlu0 %461 }
 0x5f2   :  { %1959 = vrcp.f32 %v462_v41 }
 0x5f5   :  { %v698_v46 = vpop.permute.xlu0 %697 }
 0x5f8   :  { %v1958_v42 = vpop.eup %1957 }
 0x5f9   :  { %v2205_v43 = vmul.f32 %v1958_v42, %v1954_v33 }
 0x5fb   :  { %1837 = vmatmul.mubr.msk.f32.vlgmr.msra.gmra.mrb[2].mxu0 %vm277_vm5, %v2205_v43 }
 0x5fc   :  { %v1960_v44 = vpop.eup %1959  ;;  %1845 = vmatpush3.xpose.msk.msra.mxu0 %vm277_vm5, %v622_v37  ;;  %1846 = vmatprep.mubr.msk.f32.mxu0 %vm2035_vm4, %v2034_v15 }
 0x5fd   :  { %v2212_v45 = vmul.f32 %v1960_v44, %v1956_v35  ;;  %1854 = vmatprep.subr.mxu0 %v2034_v15 }
 0x5ff   :  { %1842 = vmatmul.mubr.msk.f32.vlgmr.msra.gmra.mrb[6].mxu1 %vm277_vm5, %v2212_v45  ;;  %1847 = vmatmul.mubr.msk.f32.vlgmr.msra.gmra.mrb[4].mxu0 %vm277_vm5, %v620_v39 }
 0x600   :  { %1850 = vmatpush3.xpose.msk.msra.mxu1 %vm277_vm5, %v700_v38  ;;  %1851 = vmatprep.mubr.msk.f32.mxu1 %vm2035_vm4, %v2034_v15 }
 0x601   :  { %1859 = vmatprep.subr.mxu1 %v2034_v15  ;;  %1856 = vmatprep.mubr.msk.f32.mxu0 %vm2035_vm4, %v2034_v15 }
 0x603   :  { %1852 = vmatmul.mubr.msk.f32.vlgmr.msra.gmra.mrb[8].mxu1 %vm277_vm5, %v698_v46 }
 0x604   :  { %1861 = vmatprep.mubr.msk.f32.mxu1 %vm2035_vm4, %v2034_v15 }
 0x6ce   :  { %v2227_v47 = vpop.f32.mrb[2].mxu0 }
 0x6cf   :  { %v1838_v48 = vpop.f32.mrb[3].mxu0 }
 0x6d2   :  { %v2229_v49 = vpop.f32.mrb[6].mxu1  ;;  %v693_v50 = vpop.f32.mrb[4].mxu0 }
 0x6d3   :  { %v775_v51 = vmul.f32 0.35355338, %v693_v50  ;;  %v1843_v52 = vpop.f32.mrb[7].mxu1  ;;  %v1848_v53 = vpop.f32.mrb[5].mxu0 }
 0x6d5   :  { %v777_v54 = vmul.f32 %v775_v51, %v2187_v12 }
 0x6d6   :  { %v771_v55 = vpop.f32.mrb[8].mxu1 }
 0x6d7   :  { %v776_v56 = vmul.f32 0.35355338, %v771_v55  ;;  %v1853_v57 = vpop.f32.mrb[9].mxu1  ;;  %v779_v58 = vsel %vm277_vm5, %v777_v54, -inf }
 0x6d8   :  { %780 = vmax.xlane.f32.xlu1 %v779_v58 }
 0x6d9   :  { %v778_v59 = vmul.f32 %v776_v56, %v2189_v18 }
 0x6db   :  { %v782_v60 = vsel %vm277_vm5, %v778_v59, -inf }
 0x6dc   :  { %783 = vmax.xlane.f32.xlu0 %v782_v60 }
 0x6e9   :  { %877 = vrot.lane.b32.xlu1 %v2165_v1, %s2040_s16 }
 0x6ed   :  { %955 = vrot.lane.b32.xlu1 %v2162_v0, %s2041_s17 }
 0x6f2   :  { %801 = vrot.lane.b32.xlu0 %v2162_v0, %s2040_s16 }
 0x6f6   :  { %1033 = vrot.lane.b32.xlu0 %v2165_v1, %s2041_s17 }
 0x765   :  { %v781_v61 = vpop.xlane.xlu1 %780 }
 0x766   :  { %v785_v62 = vsub.f32 %v777_v54, %v781_v61 }
 0x768   :  { %v787_v63 = vmul.f32 1.442695, %v785_v62 }
 0x769   :  { %v784_v2 = vpop.xlane.xlu0 %783  ;;  %v878_v3 = vpop.permute.xlu1 %877 }
 0x76a   :  { %1961 = vpow2.f32 %v787_v63  ;;  %v786_v4 = vsub.f32 %v778_v59, %v784_v2  ;;  %1860 = vmatpush3.msra.mxu1 %v878_v3 }
 0x76b   :  { %1869 = vmatprep.subr.mxu1 %v2034_v15 }
 0x76c   :  { %v789_v5 = vmul.f32 1.442695, %v786_v4 }
 0x76d   :  { %v802_v6 = vpop.permute.xlu0 %801  ;;  %v956_v13 = vpop.permute.xlu1 %955 }
 0x76e   :  { %1963 = vpow2.f32 %v789_v5  ;;  %1855 = vmatpush3.msra.mxu0 %v802_v6 }
 0x76f   :  { %1864 = vmatprep.subr.mxu0 %v2034_v15 }
 0x771   :  { %v1034_v11 = vpop.permute.xlu0 %1033 }
 0x774   :  { %v1962_v7 = vpop.eup %1961 }
 0x775   :  { %v791_v8 = vsel %vm277_vm5, %v1962_v7, 0.0 }
 0x776   :  { %792 = vadd.xlane.f32.xlu0 %v791_v8 }
 0x778   :  { %v1964_v9 = vpop.eup %1963 }
 0x779   :  { %v794_v10 = vsel %vm277_vm5, %v1964_v9, 0.0 }
 0x77a   :  { %795 = vadd.xlane.f32.xlu1 %v794_v10 }
 0x78b   :  { %953 = vrot.lane.b32.xlu1 %v2162_v0, %s2042_s18 }
 0x78c   :  { %1031 = vrot.lane.b32.xlu0 %v2165_v1, %s2042_s18 }
 0x803   :  { %v793_v14 = vpop.xlane.xlu0 %792 }
 0x804   :  { %1965 = vrcp.f32 %v793_v14 }
 0x807   :  { %v796_v17 = vpop.xlane.xlu1 %795  ;;  %v1032_v23 = vpop.permute.xlu0 %1031 }
 0x808   :  { %1967 = vrcp.f32 %v796_v17 }
 0x80b   :  { %v954_v22 = vpop.permute.xlu1 %953 }
 0x80e   :  { %v1966_v19 = vpop.eup %1965 }
 0x80f   :  { %v2245_v20 = vmul.f32 %v1966_v19, %v1962_v7 }
 0x811   :  { %1857 = vmatmul.mubr.msk.f32.vlgmr.msra.gmra.mrb[6].mxu0 %vm277_vm5, %v2245_v20 }
 0x812   :  { %v1968_v21 = vpop.eup %1967  ;;  %1865 = vmatpush3.xpose.msk.msra.mxu0 %vm277_vm5, %v956_v13  ;;  %1866 = vmatprep.mubr.msk.f32.mxu0 %vm2035_vm4, %v2034_v15 }
 0x813   :  { %v2252_v16 = vmul.f32 %v1968_v21, %v1964_v9  ;;  %1874 = vmatprep.subr.mxu0 %v2034_v15 }
 0x815   :  { %1862 = vmatmul.mubr.msk.f32.vlgmr.msra.gmra.mrb[10].mxu1 %vm277_vm5, %v2252_v16  ;;  %1867 = vmatmul.mubr.msk.f32.vlgmr.msra.gmra.mrb[8].mxu0 %vm277_vm5, %v954_v22 }
 0x816   :  { %1870 = vmatpush3.xpose.msk.msra.mxu1 %vm277_vm5, %v1034_v11  ;;  %1871 = vmatprep.mubr.msk.f32.mxu1 %vm2035_vm4, %v2034_v15 }
 0x817   :  { %1879 = vmatprep.subr.mxu1 %v2034_v15  ;;  %1876 = vmatprep.mubr.msk.f32.mxu0 %vm2035_vm4, %v2034_v15 }
 0x819   :  { %1872 = vmatmul.mubr.msk.f32.vlgmr.msra.gmra.mrb[12].mxu1 %vm277_vm5, %v1032_v23 }
 0x81a   :  { %1881 = vmatprep.mubr.msk.f32.mxu1 %vm2035_vm4, %v2034_v15 }
 0x8e4   :  { %v2267_v24 = vpop.f32.mrb[6].mxu0 }
 0x8e5   :  { %v1858_v25 = vpop.f32.mrb[7].mxu0 }
 0x8e8   :  { %v2269_v26 = vpop.f32.mrb[10].mxu1  ;;  %v1027_v27 = vpop.f32.mrb[8].mxu0 }
 0x8e9   :  { %v1109_v28 = vmul.f32 0.35355338, %v1027_v27  ;;  %v1863_v29 = vpop.f32.mrb[11].mxu1  ;;  %v1868_v30 = vpop.f32.mrb[9].mxu0 }
 0x8eb   :  { %v1111_v31 = vmul.f32 %v1109_v28, %v2187_v12 }
 0x8ec   :  { %v1105_v32 = vpop.f32.mrb[12].mxu1 }
 0x8ed   :  { %v1110_v33 = vmul.f32 0.35355338, %v1105_v32  ;;  %v1873_v34 = vpop.f32.mrb[13].mxu1  ;;  %v1113_v35 = vsel %vm277_vm5, %v1111_v31, -inf }
 0x8ee   :  { %1114 = vmax.xlane.f32.xlu1 %v1113_v35 }
 0x8ef   :  { %v1112_v36 = vmul.f32 %v1110_v33, %v2189_v18 }
 0x8f1   :  { %v1116_v37 = vsel %vm277_vm5, %v1112_v36, -inf }
 0x8f2   :  { %1117 = vmax.xlane.f32.xlu0 %v1116_v37 }
 0x8ff   :  { %1211 = vrot.lane.b32.xlu1 %v2165_v1, %s2043_s19 }
 0x903   :  { %1289 = vrot.lane.b32.xlu1 %v2162_v0, %s2044_s0 }
 0x908   :  { %1135 = vrot.lane.b32.xlu0 %v2162_v0, %s2043_s19 }
 0x90c   :  { %1367 = vrot.lane.b32.xlu0 %v2165_v1, %s2044_s0 }
 0x97b   :  { %v1115_v38 = vpop.xlane.xlu1 %1114 }
 0x97c   :  { %v1119_v39 = vsub.f32 %v1111_v31, %v1115_v38 }
 0x97e   :  { %v1121_v40 = vmul.f32 1.442695, %v1119_v39 }
 0x97f   :  { %v1118_v41 = vpop.xlane.xlu0 %1117  ;;  %v1212_v42 = vpop.permute.xlu1 %1211 }
 0x980   :  { %1969 = vpow2.f32 %v1121_v40  ;;  %v1120_v44 = vsub.f32 %v1112_v36, %v1118_v41  ;;  %1880 = vmatpush3.msra.mxu1 %v1212_v42 }
 0x981   :  { %1889 = vmatprep.subr.mxu1 %v2034_v15 }
 0x982   :  { %v1123_v46 = vmul.f32 1.442695, %v1120_v44 }
 0x983   :  { %v1136_v48 = vpop.permute.xlu0 %1135  ;;  %v1290_v55 = vpop.permute.xlu1 %1289 }
 0x984   :  { %1971 = vpow2.f32 %v1123_v46  ;;  %1875 = vmatpush3.msra.mxu0 %v1136_v48 }
 0x985   :  { %1884 = vmatprep.subr.mxu0 %v2034_v15 }
 0x987   :  { %v1368_v54 = vpop.permute.xlu0 %1367 }
 0x98a   :  { %v1970_v50 = vpop.eup %1969 }
 0x98b   :  { %v1125_v51 = vsel %vm277_vm5, %v1970_v50, 0.0 }
 0x98c   :  { %1126 = vadd.xlane.f32.xlu0 %v1125_v51 }
 0x98e   :  { %v1972_v52 = vpop.eup %1971 }
 0x98f   :  { %v1128_v53 = vsel %vm277_vm5, %v1972_v52, 0.0 }
 0x990   :  { %1129 = vadd.xlane.f32.xlu1 %v1128_v53 }
 0x9a1   :  { %1287 = vrot.lane.b32.xlu1 %v2162_v0, %s2045_s3 }
 0x9a2   :  { %1365 = vrot.lane.b32.xlu0 %v2165_v1, %s2045_s3 }
 0xa19   :  { %v1127_v56 = vpop.xlane.xlu0 %1126 }
 0xa1a   :  { %1973 = vrcp.f32 %v1127_v56 }
 0xa1d   :  { %v1130_v57 = vpop.xlane.xlu1 %1129  ;;  %v1366_v63 = vpop.permute.xlu0 %1365 }
 0xa1e   :  { %1975 = vrcp.f32 %v1130_v57 }
 0xa21   :  { %v1288_v62 = vpop.permute.xlu1 %1287 }
 0xa24   :  { %v1974_v58 = vpop.eup %1973 }
 0xa25   :  { %v1132_v59 = vmul.f32 %v1974_v58, %v1970_v50 }
 0xa27   :  { %1877 = vmatmul.mubr.msk.f32.vlgmr.msra.gmra.mrb[10].mxu0 %vm277_vm5, %v1132_v59 }
 0xa28   :  { %v1976_v60 = vpop.eup %1975  ;;  %1885 = vmatpush3.xpose.msk.msra.mxu0 %vm277_vm5, %v1290_v55  ;;  %1886 = vmatprep.mubr.msk.f32.mxu0 %vm2035_vm4, %v2034_v15 }
 0xa29   :  { %v1134_v61 = vmul.f32 %v1976_v60, %v1972_v52  ;;  %1894 = vmatprep.subr.mxu0 %v2034_v15 }
 0xa2b   :  { %1882 = vmatmul.mubr.msk.f32.vlgmr.msra.gmra.mrb[14].mxu1 %vm277_vm5, %v1134_v61  ;;  %1887 = vmatmul.mubr.msk.f32.vlgmr.msra.gmra.mrb[12].mxu0 %vm277_vm5, %v1288_v62 }
 0xa2c   :  { %1890 = vmatpush3.xpose.msk.msra.mxu1 %vm277_vm5, %v1368_v54  ;;  %1891 = vmatprep.mubr.msk.f32.mxu1 %vm2035_vm4, %v2034_v15 }
 0xa2d   :  { %1899 = vmatprep.subr.mxu1 %v2034_v15  ;;  %1896 = vmatprep.mubr.msk.f32.mxu0 %vm2035_vm4, %v2034_v15 }
 0xa2f   :  { %1892 = vmatmul.mubr.msk.f32.vlgmr.msra.gmra.mrb[16].mxu1 %vm277_vm5, %v1366_v63 }
 0xa30   :  { %1901 = vmatprep.mubr.msk.f32.mxu1 %vm2035_vm4, %v2034_v15 }
 0xafa   :  { %v1207_v2 = vpop.f32.mrb[10].mxu0 }
 0xafb   :  { %v1878_v3 = vpop.f32.mrb[11].mxu0 }
 0xafe   :  { %v1283_v4 = vpop.f32.mrb[14].mxu1  ;;  %v1361_v5 = vpop.f32.mrb[12].mxu0 }
 0xaff   :  { %v1443_v6 = vmul.f32 0.35355338, %v1361_v5  ;;  %v1883_v7 = vpop.f32.mrb[15].mxu1  ;;  %v1888_v8 = vpop.f32.mrb[13].mxu0 }
 0xb01   :  { %v1445_v9 = vmul.f32 %v1443_v6, %v2187_v12 }
 0xb02   :  { %v1439_v10 = vpop.f32.mrb[16].mxu1 }
 0xb03   :  { %v1444_v11 = vmul.f32 0.35355338, %v1439_v10  ;;  %v1893_v13 = vpop.f32.mrb[17].mxu1  ;;  %v1447_v14 = vsel %vm277_vm5, %v1445_v9, -inf }
 0xb04   :  { %1448 = vmax.xlane.f32.xlu1 %v1447_v14 }
 0xb05   :  { %v1446_v17 = vmul.f32 %v1444_v11, %v2189_v18 }
 0xb07   :  { %v1450_v19 = vsel %vm277_vm5, %v1446_v17, -inf }
 0xb08   :  { %1451 = vmax.xlane.f32.xlu0 %v1450_v19 }
 0xb91   :  { %v1449_v15 = vpop.xlane.xlu1 %1448 }
 0xb92   :  { %v1453_v21 = vsub.f32 %v1445_v9, %v1449_v15 }
 0xb94   :  { %v1455_v22 = vmul.f32 1.442695, %v1453_v21 }
 0xb95   :  { %v1452_v23 = vpop.xlane.xlu0 %1451 }
 0xb96   :  { %1977 = vpow2.f32 %v1455_v22  ;;  %v1454_v25 = vsub.f32 %v1446_v17, %v1452_v23 }
 0xb98   :  { %v1457_v27 = vmul.f32 1.442695, %v1454_v25 }
 0xb9a   :  { %1979 = vpow2.f32 %v1457_v27 }
 0xba0   :  { %v1978_v12 = vpop.eup %1977 }
 0xba1   :  { %v1459_v28 = vsel %vm277_vm5, %v1978_v12, 0.0 }
 0xba2   :  { %1460 = vadd.xlane.f32.xlu0 %v1459_v28 }
 0xba4   :  { %v1980_v29 = vpop.eup %1979 }
 0xba5   :  { %v1462_v30 = vsel %vm277_vm5, %v1980_v29, 0.0 }
 0xba6   :  { %1463 = vadd.xlane.f32.xlu1 %v1462_v30 }
 0xbb7   :  { %1545 = vrot.lane.b32.xlu1 %v2165_v1, %s2046_s20 }
 0xbb8   :  { %1469 = vrot.lane.b32.xlu0 %v2162_v0, %s2046_s20 }
 0xbbb   :  { %1623 = vrot.lane.b32.xlu1 %v2267_v24, %s2047_s2 }
 0xbbc   :  { %1625 = vrot.lane.b32.xlu0 %v2269_v26, %s2047_s2 }
 0xbbf   :  { %1655 = vrot.lane.b32.xlu1 %v2245_v20, %s2047_s2 }
 0xbc0   :  { %1657 = vrot.lane.b32.xlu0 %v2252_v16, %s2047_s2 }
 0xbc3   :  { %1631 = vrot.lane.b32.xlu1 %v1207_v2, %s2048_s21 }
 0xbc4   :  { %1633 = vrot.lane.b32.xlu0 %v1283_v4, %s2048_s21 }
 0xbc7   :  { %1661 = vrot.lane.b32.xlu1 %v1132_v59, %s2048_s21 }
 0xbc8   :  { %1663 = vrot.lane.b32.xlu0 %v1134_v61, %s2048_s21 }
 0xc2f   :  { %v1461_v1 = vpop.xlane.xlu0 %1460 }
 0xc30   :  { %1981 = vrcp.f32 %v1461_v1 }
 0xc33   :  { %v1470_v0 = vpop.permute.xlu0 %1469  ;;  %v1464_v18 = vpop.xlane.xlu1 %1463 }
 0xc34   :  { %1983 = vrcp.f32 %v1464_v18  ;;  %1895 = vmatpush3.msra.mxu0 %v1470_v0 }
 0xc37   :  { %v1546_v24 = vpop.permute.xlu1 %1545  ;;  %v1626_v37 = vpop.permute.xlu0 %1625 }
 0xc38   :  { %1900 = vmatpush3.msra.mxu1 %v1546_v24  ;;  %v1646_v52 = vsel %vm277_vm5, %v2229_v49, %v1626_v37 }
 0xc3a   :  { %v1982_v26 = vpop.eup %1981 }
 0xc3b   :  { %v1466_v31 = vmul.f32 %v1982_v26, %v1978_v12  ;;  %v1624_v36 = vpop.permute.xlu1 %1623  ;;  %v1658_v39 = vpop.permute.xlu0 %1657 }
 0xc3c   :  { %v1645_v44 = vsel %vm277_vm5, %v2227_v47, %v1624_v36 }
 0xc3d   :  { %1897 = vmatmul.mubr.msk.f32.vlgmr.msra.gmra.mrb[14].mxu0 %vm277_vm5, %v1466_v31 }
 0xc3e   :  { %v1984_v20 = vpop.eup %1983 }
 0xc3f   :  { %v1468_v32 = vmul.f32 %v1984_v20, %v1980_v29  ;;  %v1656_v38 = vpop.permute.xlu1 %1655  ;;  %v1634_v41 = vpop.permute.xlu0 %1633 }
 0xc40   :  { %v1673_v53 = vsel %vm277_vm5, %v2205_v43, %v1656_v38  ;;  %v1649_v54 = vsel %vm1647_vm7, %v1646_v52, %v1634_v41  ;;  %v1674_v43 = vsel %vm277_vm5, %v2212_v45, %v1658_v39 }
 0xc41   :  { %1902 = vmatmul.mubr.msk.f32.vlgmr.msra.gmra.mrb[18].mxu1 %vm277_vm5, %v1468_v32 }
 0xc43   :  { %v1632_v40 = vpop.permute.xlu1 %1631  ;;  %v1664_v46 = vpop.permute.xlu0 %1663 }
 0xc44   :  { %v1648_v48 = vsel %vm1647_vm7, %v1645_v44, %v1632_v40 }
 0xc47   :  { %v1662_v42 = vpop.permute.xlu1 %1661 }
 0xc48   :  { %v1675_v47 = vsel %vm1647_vm7, %v1673_v53, %v1662_v42 }
 0xd10   :  { %v1541_v16 = vpop.f32.mrb[14].mxu0 }
 0xd11   :  { %1639 = vrot.lane.b32.xlu1 %v1541_v16, %s2049_s22  ;;  %v1898_v33 = vpop.f32.mrb[15].mxu0 }
 0xd14   :  { %v1617_v34 = vpop.f32.mrb[18].mxu1 }
 0xd15   :  { %1641 = vrot.lane.b32.xlu0 %v1617_v34, %s2049_s22  ;;  %v1903_v35 = vpop.f32.mrb[19].mxu1  ;;  %1667 = vrot.lane.b32.xlu1 %v1466_v31, %s2049_s22 }
 0xd19   :  { %1669 = vrot.lane.b32.xlu0 %v1468_v32, %s2049_s22 }
 0xd83   :  { %v1640_v50 = vpop.permute.xlu1 %1639 }
 0xd84   :  { %v1651_v51 = vsel %vm1650_vm6, %v1648_v48, %v1640_v50 }
 0xd85   :  { %1653 = vst.msk [vmem:[#allocation2] sm:$0xff] %vm136_vm3, %v1651_v51 }
 0xd87   :  { %v1642_v55 = vpop.permute.xlu0 %1641  ;;  %v1668_v56 = vpop.permute.xlu1 %1667 }
 0xd88   :  { %v1652_v57 = vsel %vm1650_vm6, %v1649_v54, %v1642_v55  ;;  %v1677_v58 = vsel %vm1650_vm6, %v1675_v47, %v1668_v56 }
 0xd89   :  { %1654 = vst.msk [vmem:[#allocation2 + $0x8] sm:$0xff] %vm136_vm3, %v1652_v57  ;;  %1679 = vst.msk [vmem:[#allocation4] sm:$0xff] %vm136_vm3, %v1677_v58 }
 0xd8a   :  { %1996 = shalt.err (!%p1993_p4)
}
 0xd8b   :  { %s1997_s4 = scalar_lea.hbm %s2371_s6, 256 }
 0xd8c   :  { %p1998_p5 = scmp.ne.s32.totalorder %s2371_s6, %s1997_s4  ;;  %p2001_p6 = scmp.lt.u32.totalorder %s1997_s4, %s2371_s6 }
 0xd8e   :  { %p2003_p7 = pnand %p2001_p6, %p1998_p5 }
 0xd90   :  { %2006 = shalt.err (!%p2003_p7)
}
 0xd91   :  { %s2052_s5 = smov 128   ;;  %v1676_v45 = vsel %vm1647_vm7, %v1674_v43, %v1664_v46  ;;  %v1670_v49 = vpop.permute.xlu0 %1669  ;;  %s2007_s13 = scalar_lea.vmem %s1699_s26, 256 }
 0xd92   :  { %1692 = dma.vmem_to_hbm [thread:$0]  %s1687_s24, 256, %s2371_s6, [#allocation3], %s2052_s5, %s2052_s5, %s2047_s2   ;;  %v1678_v59 = vsel %vm1650_vm6, %v1676_v45, %v1670_v49 }
 0xd93   :  { %1680 = vst.msk [vmem:[#allocation4 + $0x8] sm:$0xff] %vm136_vm3, %v1678_v59  ;;  %p2008_p8 = scmp.ne.s32.totalorder %s1699_s26, %s2007_s13  ;;  %p2012_p9 = scmp.lt.s32.totalorder %s1699_s26, %s1699_s26 }
 0xd94   :  { %p2013_p10 = scmp.lt.s32.totalorder %s2007_s13, %s2007_s13 }
 0xd96   :  { %p2014_p11 = por %p2013_p10, %p2012_p9 }
 0xd98   :  { %p2015_p12 = pnand %p2014_p11, %p2008_p8 }
 0xd9a   :  { %2018 = shalt.err (!%p2015_p12)
}
 0xd9b   :  { %s2019_s15 = scalar_lea.hbm %s2372_s7, 256 }
 0xd9c   :  { %p2020_p13 = scmp.ne.s32.totalorder %s2372_s7, %s2019_s15  ;;  %p2023_p0 = scmp.lt.u32.totalorder %s2019_s15, %s2372_s7 }
 0xd9e   :  { %p2025_p1 = pnand %p2023_p0, %p2020_p13 }
 0xda0   :  { %2028 = shalt.err (!%p2025_p1)
}
 0xda1   :  { %1704 = dma.vmem_to_hbm [thread:$0]  %s1699_s26, 256, %s2372_s7, [#allocation5], %s2052_s5, %s2052_s5, %s2047_s2  }
 0xda2   :  { %2029 = dma.done.wait [#allocation3], 256  }
 0xda3   :  { %2030 = vsyncadd [#allocation3], 4294967040 }
 0xda4   :  { %2031 = dma.done.wait [#allocation5], 256  }
 0xda5   :  { %2032 = vsyncadd [#allocation5], 4294967040 }
 0xda6   :  { %1711 = vsyncpa [#allocation3], 1 }
 0xda7   :  { %1712 = vsyncpa [#allocation5], 1 }

</bundles_post_ra>
